<compile_context>
chip_gen: v7x
topology: tpu7x:2x2x1
jax: 0.10.0
libtpu: 0.0.40
codegen_flags: <defaults>
</compile_context>

<pallas_src>
import functools

import jax
import jax.numpy as jnp
from jax.experimental import pallas as pl
from jax.experimental.pallas import tpu as pltpu


def _round_up(x, m):
    return ((x + m - 1) // m) * m


@functools.lru_cache(maxsize=None)
def _physical_vmem_bytes():
    """Per-TensorCore VMEM capacity; conservative v7x default if unavailable."""
    try:
        info = pltpu.get_tpu_info()
        v = getattr(info, "vmem_capacity_bytes", None)
        if v:
            return int(v)
    except Exception:
        pass
    return 64 << 20


def _gap_kernel(x_ref, o_ref, *, inv_l):
    """One row-tile of the global average pool.

    x_ref: (TM, L)  rows = (n, c) pairs, cols = flattened H*W spatial positions
    o_ref: (TM, 1)  per-row spatial mean
    """
    s = jnp.sum(x_ref[...].astype(jnp.float32), axis=-1, keepdims=True)
    o_ref[...] = (s * inv_l).astype(o_ref.dtype)


@jax.jit
def global_avg_pool(feat):
    """GlobalAvgPool forward: (N, C, H, W) -> (N, C), mean over H, W."""
    N, C, H, W = feat.shape
    assert H == W, "GlobalAvgPool expects square spatial dims (feat.size(2) == feat.size(3))"

    M = N * C          # one output scalar per (n, c) row
    L = H * W          # reduction length (lane axis)
    x2d = feat.reshape(M, L)          # contiguous view of NCHW -- no data movement

    # --- tile sizing ---------------------------------------------------------
    itemsize = jnp.dtype(feat.dtype).itemsize
    packing = 8 * max(1, 4 // itemsize)        # sublane packing: f32->8, bf16->16, int8->32

    phys_vmem = _physical_vmem_bytes()
    # Budget for the double-buffered input block: half of physical VMEM,
    # capped at 32 MiB (ample on 128-MiB v5e/v6e, leaves headroom on 64-MiB v7x).
    input_db_budget = min(32 << 20, phys_vmem // 2)

    TM = 4096
    while TM > packing and 2 * TM * L * itemsize > input_db_budget:
        TM //= 2
    TM = max(TM, packing)

    if M < packing:
        TM = M                                   # full-extent block (== array dim)
    else:
        TM = min(TM, (M // packing) * packing)   # never exceed the array; keep packing multiple
        # Ensure >= 2 grid steps where possible so both v7x TensorCores get work.
        if pl.cdiv(M, TM) < 2 and M > packing:
            TM = _round_up(pl.cdiv(M, 2), packing)

    num_tiles = pl.cdiv(M, TM)

    # --- scoped VMEM limit from the actual footprint -------------------------
    in_block_bytes = TM * L * itemsize
    out_block_bytes = TM * 128 * itemsize        # (TM, 1) VMEM tile pads to 128 lanes
    vmem_needed = 2 * in_block_bytes + 2 * out_block_bytes + (2 << 20)
    # Leave >=16 MiB below physical VMEM (=> <=48 MiB on v7x, <=112 MiB on v5e/v6e).
    vmem_limit = int(min(max(vmem_needed, 8 << 20), phys_vmem - (16 << 20)))

    out = pl.pallas_call(
        functools.partial(_gap_kernel, inv_l=1.0 / float(L)),
        out_shape=jax.ShapeDtypeStruct((M, 1), feat.dtype),
        grid_spec=pltpu.PrefetchScalarGridSpec(
            num_scalar_prefetch=0,
            grid=(num_tiles,),
            in_specs=[pl.BlockSpec((TM, L), lambda i: (i, 0))],
            out_specs=pl.BlockSpec((TM, 1), lambda i: (i, 0)),
        ),
        compiler_params=pltpu.CompilerParams(
            dimension_semantics=("parallel",),
            vmem_limit_bytes=vmem_limit,
        ),
    )(x2d)

    return out.reshape(N, C)


def _reference(feat):
    return jnp.mean(feat, axis=(2, 3))


if __name__ == "__main__":
    # Small shapes consistent with the module: batch=2, channels=4, spatial=16x16.
    N, C, H, W = 2, 4, 16, 16

    key = jax.random.PRNGKey(0)
    feat = jax.random.normal(key, (N, C, H, W), dtype=jnp.float32)

    out = jax.block_until_ready(global_avg_pool(feat))

    ref = _reference(feat)
    assert out.shape == (N, C)
    assert bool(jnp.all(jnp.isfinite(out)))
    assert bool(jnp.allclose(out, ref, atol=1e-5, rtol=1e-5))

    print("KERNEL_OK")
</pallas_src>

<mosaic_0001>
module attributes {stable_mosaic.version = 11 : i64} {
  func.func @_gap_kernel(%arg0: i32, %arg1: memref<8x256xf32, #tpu.memory_space<vmem>>, %arg2: memref<8x1xf32, #tpu.memory_space<vmem>>) attributes {dimension_semantics = [#tpu.dimension_semantics<parallel>], iteration_bounds = array<i64: 1>, scalar_prefetch = 0 : i64, scratch_operands = 0 : i64, tpu.core_type = #tpu.core_type<tc>, window_params = [{transform_indices = @transform_0, window_bounds = array<i64: 8, 256>}, {transform_indices = @transform_1, window_bounds = array<i64: 8, 1>}]} {
    %c0 = arith.constant 0 : index
    %c0_0 = arith.constant 0 : index
    %0 = vector.load %arg1[%c0, %c0_0] : memref<8x256xf32, #tpu.memory_space<vmem>>, vector<8x256xf32>
    %cst = arith.constant dense<0.000000e+00> : vector<8xf32>
    %1 = vector.multi_reduction <add>, %0, %cst [1] : vector<8x256xf32> to vector<8xf32>
    %2 = vector.shape_cast %1 : vector<8xf32> to vector<8x1xf32>
    %cst_1 = arith.constant 3.906250e-03 : f32
    %3 = vector.broadcast %cst_1 : f32 to vector<8x1xf32>
    %4 = arith.mulf %2, %3 : vector<8x1xf32>
    %c0_2 = arith.constant 0 : index
    %c0_3 = arith.constant 0 : index
    %5 = vector.load %arg2[%c0_2, %c0_3] : memref<8x1xf32, #tpu.memory_space<vmem>>, vector<8x1xf32>
    tpu.vector_store %arg2[%c0_2, %c0_3], %4 {strides = array<i32>} : memref<8x1xf32, #tpu.memory_space<vmem>>, vector<8x1xf32>,
    return
  }
  func.func @transform_0(%arg0: i32) -> (i32, i32) {
    %c0_i32 = arith.constant 0 : i32
    %c0_i32_0 = arith.constant 0 : i32
    return %arg0, %c0_i32 : i32, i32
  }
  func.func @transform_1(%arg0: i32) -> (i32, i32) {
    %c0_i32 = arith.constant 0 : i32
    %c0_i32_0 = arith.constant 0 : i32
    return %arg0, %c0_i32 : i32, i32
  }
}

</mosaic_0001>

<bundles_post_ra>
// kernel: global_avg_pool.1
= control target key start
LH: loop header
LB: loop body
LE: loop exit
PB: predicated region body
PF: predicated region fallthrough
CT: control target
= control target key end

     0   :  { %vm14_vm0 = vcmask 7168   ;;  %s39_s0 = inlined_call_operand.vmem [shape: f32[8,256], index: 0, kind: input, shape index: {}]   ;;  %s40_s1 = inlined_call_operand.vmem [shape: f32[8,1], index: 1, kind: output, shape index: {}]  }
   0x1   :  { %v8_v0 = vld [vmem:[%s39_s0] sm:$0xff]  ;;  %v9_v1 = vld [vmem:[%s39_s0 + $0x8] sm:$0xff] }
   0x2   :  { %v10_v2 = vadd.f32 %v9_v1, %v8_v0 }
   0x4   :  { %11 = vadd.xlane.f32.xlu0 %v10_v2 }
  0x91   :  { %v12_v3 = vpop.xlane.xlu0 %11 }
  0x92   :  { %v13_v4 = vmul.f32 0.00390625, %v12_v3 }
  0x94   :  { %15 = vst.msk [vmem:[%s40_s1] sm:$0xff] %vm14_vm0, %v13_v4 }

</bundles_post_ra>
